<compile_context>
chip_gen: v6e
topology: v6e:2x2x1
jax: 0.10.0
libtpu: 0.0.40
codegen_flags: <defaults>
</compile_context>

<pallas_src>
import jax
import jax.numpy as jnp
import numpy as np
from jax.experimental import pallas as pl
from jax.experimental.pallas import tpu as pltpu

KSIZE = 3  # nn.Conv2d(..., 3) -> 3x3 kernel, stride 1, no padding (VALID)


def encoder_block_kernel(x_ref, w1_ref, b1_ref, w2_ref, b2_ref, o_ref):
    # x_ref : (1, H, W*Cin)                 lane-dense input rows for this image
    # w1_ref: (3, W*Cin,  Wo1*Cmid)         conv1 banded row-weights, one per kh
    # b1_ref: (1, Wo1*Cmid)                 conv1 bias, tiled per output column
    # w2_ref: (3, Wo1*Cmid, Wo2*Cout)       conv2 banded row-weights
    # b2_ref: (1, Wo2*Cout)
    # o_ref : (1, Ho2, Wo2*Cout)            lane-dense output rows
    _, H, _ = x_ref.shape
    Ho1 = H - (KSIZE - 1)
    Ho2 = Ho1 - (KSIZE - 1)

    # ---- conv1 (3 MXU matmuls) + bias + ReLU; result stays in registers ----
    h1 = jnp.dot(x_ref[0, 0:Ho1, :], w1_ref[0], preferred_element_type=jnp.float32)
    for kh in range(1, KSIZE):
        h1 = h1 + jnp.dot(x_ref[0, kh:kh + Ho1, :], w1_ref[kh],
                          preferred_element_type=jnp.float32)
    h1 = jnp.maximum(h1 + b1_ref[...], 0.0)          # (Ho1, Wo1*Cmid)

    # ---- conv2 (3 MXU matmuls) + bias + ReLU ----
    h2 = jnp.dot(h1[0:Ho2, :], w2_ref[0], preferred_element_type=jnp.float32)
    for kh in range(1, KSIZE):
        h2 = h2 + jnp.dot(h1[kh:kh + Ho2, :], w2_ref[kh],
                          preferred_element_type=jnp.float32)
    h2 = jnp.maximum(h2 + b2_ref[...], 0.0)          # (Ho2, Wo2*Cout)

    o_ref[0] = h2.astype(o_ref.dtype)


def _build_row_weights(w, w_in, c_in, w_out, c_out):
    """Turn PyTorch OIHW conv weights into 3 banded row-matrices.

    Returns B of shape (3, w_in*c_in, w_out*c_out) with
      B[kh, (j+kw)*c_in + ci, j*c_out + co] = w[co, ci, kh, kw]
    so that  out_row[i] = sum_kh  in_row[i+kh] @ B[kh]  implements the conv.
    """
    j, kw, ci, co = np.meshgrid(np.arange(w_out), np.arange(KSIZE),
                                np.arange(c_in), np.arange(c_out), indexing="ij")
    rows = (j + kw) * c_in + ci          # (w_out, 3, c_in, c_out), all unique w/ cols
    cols = j * c_out + co
    mats = []
    for kh in range(KSIZE):
        vals = w[co, ci, kh, kw]         # (w_out, 3, c_in, c_out)
        m = jnp.zeros((w_in * c_in, w_out * c_out), w.dtype).at[rows, cols].set(vals)
        mats.append(m)
    return jnp.stack(mats, axis=0)


def encoder_block(x_nchw, w1, b1, w2, b2):
    """x_nchw: (N, Cin, H, W); w: (Cout, Cin, 3, 3) [PyTorch layout]; returns NCHW."""
    N, Cin, H, W = x_nchw.shape
    Cmid = w1.shape[0]
    Cout = w2.shape[0]
    Ho1, Wo1 = H - (KSIZE - 1), W - (KSIZE - 1)
    Ho2, Wo2 = Ho1 - (KSIZE - 1), Wo1 - (KSIZE - 1)

    # NCHW -> lane-dense row layout (N, H, W*Cin)
    x_rows = jnp.transpose(x_nchw, (0, 2, 3, 1)).reshape(N, H, W * Cin)

    # Banded row-weight matrices (built once, tiny) + column-tiled biases.
    w1b = _build_row_weights(w1, W, Cin, Wo1, Cmid)      # (3, W*Cin,  Wo1*Cmid)
    w2b = _build_row_weights(w2, Wo1, Cmid, Wo2, Cout)   # (3, Wo1*Cmid, Wo2*Cout)
    b1r = jnp.tile(b1, (Wo1,)).reshape(1, Wo1 * Cmid)
    b2r = jnp.tile(b2, (Wo2,)).reshape(1, Wo2 * Cout)

    out_rows = pl.pallas_call(
        encoder_block_kernel,
        out_shape=jax.ShapeDtypeStruct((N, Ho2, Wo2 * Cout), x_nchw.dtype),
        grid_spec=pltpu.PrefetchScalarGridSpec(
            num_scalar_prefetch=0,
            grid=(N,),
            in_specs=[
                pl.BlockSpec((1, H, W * Cin), lambda n: (n, 0, 0)),
                pl.BlockSpec((KSIZE, W * Cin, Wo1 * Cmid), lambda n: (0, 0, 0)),
                pl.BlockSpec((1, Wo1 * Cmid), lambda n: (0, 0)),
                pl.BlockSpec((KSIZE, Wo1 * Cmid, Wo2 * Cout), lambda n: (0, 0, 0)),
                pl.BlockSpec((1, Wo2 * Cout), lambda n: (0, 0)),
            ],
            out_specs=pl.BlockSpec((1, Ho2, Wo2 * Cout), lambda n: (n, 0, 0)),
        ),
        compiler_params=pltpu.CompilerParams(
            dimension_semantics=("parallel",)),
    )(x_rows, w1b, b1r, w2b, b2r)

    # (N, Ho2, Wo2*Cout) -> NCHW to match the PyTorch module's output convention.
    out_nhwc = out_rows.reshape(N, Ho2, Wo2, Cout)
    return jnp.transpose(out_nhwc, (0, 3, 1, 2))


def encoder_block_reference(x_nchw, w1, b1, w2, b2):
    """Plain-JAX reference with the exact PyTorch semantics (for verification)."""
    dn = ("NCHW", "OIHW", "NCHW")
    y = jax.lax.conv_general_dilated(x_nchw, w1, (1, 1), "VALID", dimension_numbers=dn)
    y = jnp.maximum(y + b1[None, :, None, None], 0.0)
    y = jax.lax.conv_general_dilated(y, w2, (1, 1), "VALID", dimension_numbers=dn)
    return jnp.maximum(y + b2[None, :, None, None], 0.0)


if __name__ == "__main__":
    # Small shapes consistent with EncoderBlock(channels_in=4, channels_out=8)
    N, Cin, H, W = 2, 4, 16, 16
    Cout = 8

    key = jax.random.PRNGKey(0)
    k1, k2, k3, k4, k5 = jax.random.split(key, 5)

    # Deterministic parameter init (PyTorch-style uniform bounds, synthetic values)
    fan1 = Cin * KSIZE * KSIZE
    bound1 = 1.0 / np.sqrt(fan1)
    w1 = jax.random.uniform(k1, (Cout, Cin, KSIZE, KSIZE), jnp.float32, -bound1, bound1)
    b1 = jax.random.uniform(k2, (Cout,), jnp.float32, -bound1, bound1)

    fan2 = Cout * KSIZE * KSIZE
    bound2 = 1.0 / np.sqrt(fan2)
    w2 = jax.random.uniform(k3, (Cout, Cout, KSIZE, KSIZE), jnp.float32, -bound2, bound2)
    b2 = jax.random.uniform(k4, (Cout,), jnp.float32, -bound2, bound2)

    x = jax.random.normal(k5, (N, Cin, H, W), jnp.float32)

    out = jax.block_until_ready(encoder_block(x, w1, b1, w2, b2))
    ref = jax.block_until_ready(encoder_block_reference(x, w1, b1, w2, b2))

    assert out.shape == (N, Cout, H - 4, W - 4), out.shape
    np.testing.assert_allclose(np.asarray(out), np.asarray(ref), rtol=1e-4, atol=1e-5)

    print("KERNEL_OK")
</pallas_src>

<mosaic_0001>
module attributes {stable_mosaic.version = 11 : i64} {
  func.func @encoder_block_kernel(%arg0: i32, %arg1: memref<1x16x64xf32, #tpu.memory_space<vmem>>, %arg2: memref<3x64x112xf32, #tpu.memory_space<vmem>>, %arg3: memref<1x112xf32, #tpu.memory_space<vmem>>, %arg4: memref<3x112x96xf32, #tpu.memory_space<vmem>>, %arg5: memref<1x96xf32, #tpu.memory_space<vmem>>, %arg6: memref<1x12x96xf32, #tpu.memory_space<vmem>>) attributes {dimension_semantics = [#tpu.dimension_semantics<parallel>], iteration_bounds = array<i64: 2>, scalar_prefetch = 0 : i64, scratch_operands = 0 : i64, tpu.core_type = #tpu.core_type<tc>, window_params = [{transform_indices = @transform_0, window_bounds = array<i64: 1, 16, 64>}, {pipeline_mode = #tpu.pipeline_mode<synchronous>, transform_indices = @transform_1, window_bounds = array<i64: 3, 64, 112>}, {pipeline_mode = #tpu.pipeline_mode<synchronous>, transform_indices = @transform_2, window_bounds = array<i64: 1, 112>}, {pipeline_mode = #tpu.pipeline_mode<synchronous>, transform_indices = @transform_3, window_bounds = array<i64: 3, 112, 96>}, {pipeline_mode = #tpu.pipeline_mode<synchronous>, transform_indices = @transform_4, window_bounds = array<i64: 1, 96>}, {transform_indices = @transform_5, window_bounds = array<i64: 1, 12, 96>}]} {
    %c0 = arith.constant 0 : index
    %c0_0 = arith.constant 0 : index
    %c0_1 = arith.constant 0 : index
    %0 = vector.load %arg1[%c0, %c0_0, %c0_1] : memref<1x16x64xf32, #tpu.memory_space<vmem>>, vector<1x14x64xf32>
    %1 = vector.shape_cast %0 : vector<1x14x64xf32> to vector<14x64xf32>
    %c0_2 = arith.constant 0 : index
    %c0_3 = arith.constant 0 : index
    %c0_4 = arith.constant 0 : index
    %2 = vector.load %arg2[%c0_2, %c0_3, %c0_4] : memref<3x64x112xf32, #tpu.memory_space<vmem>>, vector<1x64x112xf32>
    %3 = vector.shape_cast %2 : vector<1x64x112xf32> to vector<64x112xf32>
    %cst = arith.constant dense<0.000000e+00> : vector<14x112xf32>
    %4 = tpu.matmul %1, %3, %cst {dimension_numbers = #tpu.dot_dimension_numbers<[1], [0], [0], [1], [0, 0, 1, 1], [], []>} : vector<14x64xf32>, vector<64x112xf32>, vector<14x112xf32> -> vector<14x112xf32>
    %c0_5 = arith.constant 0 : index
    %c1 = arith.constant 1 : index
    %c0_6 = arith.constant 0 : index
    %5 = vector.load %arg1[%c0_5, %c1, %c0_6] : memref<1x16x64xf32, #tpu.memory_space<vmem>>, vector<1x14x64xf32>
    %6 = vector.shape_cast %5 : vector<1x14x64xf32> to vector<14x64xf32>
    %c1_7 = arith.constant 1 : index
    %c0_8 = arith.constant 0 : index
    %c0_9 = arith.constant 0 : index
    %7 = vector.load %arg2[%c1_7, %c0_8, %c0_9] : memref<3x64x112xf32, #tpu.memory_space<vmem>>, vector<1x64x112xf32>
    %8 = vector.shape_cast %7 : vector<1x64x112xf32> to vector<64x112xf32>
    %cst_10 = arith.constant dense<0.000000e+00> : vector<14x112xf32>
    %9 = tpu.matmul %6, %8, %cst_10 {dimension_numbers = #tpu.dot_dimension_numbers<[1], [0], [0], [1], [0, 0, 1, 1], [], []>} : vector<14x64xf32>, vector<64x112xf32>, vector<14x112xf32> -> vector<14x112xf32>
    %10 = arith.addf %4, %9 : vector<14x112xf32>
    %c0_11 = arith.constant 0 : index
    %c2 = arith.constant 2 : index
    %c0_12 = arith.constant 0 : index
    %11 = vector.load %arg1[%c0_11, %c2, %c0_12] : memref<1x16x64xf32, #tpu.memory_space<vmem>>, vector<1x14x64xf32>
    %12 = vector.shape_cast %11 : vector<1x14x64xf32> to vector<14x64xf32>
    %c2_13 = arith.constant 2 : index
    %c0_14 = arith.constant 0 : index
    %c0_15 = arith.constant 0 : index
    %13 = vector.load %arg2[%c2_13, %c0_14, %c0_15] : memref<3x64x112xf32, #tpu.memory_space<vmem>>, vector<1x64x112xf32>
    %14 = vector.shape_cast %13 : vector<1x64x112xf32> to vector<64x112xf32>
    %cst_16 = arith.constant dense<0.000000e+00> : vector<14x112xf32>
    %15 = tpu.matmul %12, %14, %cst_16 {dimension_numbers = #tpu.dot_dimension_numbers<[1], [0], [0], [1], [0, 0, 1, 1], [], []>} : vector<14x64xf32>, vector<64x112xf32>, vector<14x112xf32> -> vector<14x112xf32>
    %16 = arith.addf %10, %15 : vector<14x112xf32>
    %c0_17 = arith.constant 0 : index
    %c0_18 = arith.constant 0 : index
    %17 = vector.load %arg3[%c0_17, %c0_18] : memref<1x112xf32, #tpu.memory_space<vmem>>, vector<1x112xf32>
    %18 = vector.broadcast %17 : vector<1x112xf32> to vector<14x112xf32>
    %19 = arith.addf %16, %18 : vector<14x112xf32>
    %cst_19 = arith.constant 0.000000e+00 : f32
    %20 = vector.broadcast %cst_19 : f32 to vector<14x112xf32>
    %21 = arith.maximumf %19, %20 : vector<14x112xf32>
    %22 = vector.extract_strided_slice %21 {offsets = [0, 0], sizes = [12, 112], strides = [1, 1]} : vector<14x112xf32> to vector<12x112xf32>
    %c0_20 = arith.constant 0 : index
    %c0_21 = arith.constant 0 : index
    %c0_22 = arith.constant 0 : index
    %23 = vector.load %arg4[%c0_20, %c0_21, %c0_22] : memref<3x112x96xf32, #tpu.memory_space<vmem>>, vector<1x112x96xf32>
    %24 = vector.shape_cast %23 : vector<1x112x96xf32> to vector<112x96xf32>
    %cst_23 = arith.constant dense<0.000000e+00> : vector<12x96xf32>
    %25 = tpu.matmul %22, %24, %cst_23 {dimension_numbers = #tpu.dot_dimension_numbers<[1], [0], [0], [1], [0, 0, 1, 1], [], []>} : vector<12x112xf32>, vector<112x96xf32>, vector<12x96xf32> -> vector<12x96xf32>
    %26 = vector.extract_strided_slice %21 {offsets = [1, 0], sizes = [12, 112], strides = [1, 1]} : vector<14x112xf32> to vector<12x112xf32>
    %c1_24 = arith.constant 1 : index
    %c0_25 = arith.constant 0 : index
    %c0_26 = arith.constant 0 : index
    %27 = vector.load %arg4[%c1_24, %c0_25, %c0_26] : memref<3x112x96xf32, #tpu.memory_space<vmem>>, vector<1x112x96xf32>
    %28 = vector.shape_cast %27 : vector<1x112x96xf32> to vector<112x96xf32>
    %cst_27 = arith.constant dense<0.000000e+00> : vector<12x96xf32>
    %29 = tpu.matmul %26, %28, %cst_27 {dimension_numbers = #tpu.dot_dimension_numbers<[1], [0], [0], [1], [0, 0, 1, 1], [], []>} : vector<12x112xf32>, vector<112x96xf32>, vector<12x96xf32> -> vector<12x96xf32>
    %30 = arith.addf %25, %29 : vector<12x96xf32>
    %31 = vector.extract_strided_slice %21 {offsets = [2, 0], sizes = [12, 112], strides = [1, 1]} : vector<14x112xf32> to vector<12x112xf32>
    %c2_28 = arith.constant 2 : index
    %c0_29 = arith.constant 0 : index
    %c0_30 = arith.constant 0 : index
    %32 = vector.load %arg4[%c2_28, %c0_29, %c0_30] : memref<3x112x96xf32, #tpu.memory_space<vmem>>, vector<1x112x96xf32>
    %33 = vector.shape_cast %32 : vector<1x112x96xf32> to vector<112x96xf32>
    %cst_31 = arith.constant dense<0.000000e+00> : vector<12x96xf32>
    %34 = tpu.matmul %31, %33, %cst_31 {dimension_numbers = #tpu.dot_dimension_numbers<[1], [0], [0], [1], [0, 0, 1, 1], [], []>} : vector<12x112xf32>, vector<112x96xf32>, vector<12x96xf32> -> vector<12x96xf32>
    %35 = arith.addf %30, %34 : vector<12x96xf32>
    %c0_32 = arith.constant 0 : index
    %c0_33 = arith.constant 0 : index
    %36 = vector.load %arg5[%c0_32, %c0_33] : memref<1x96xf32, #tpu.memory_space<vmem>>, vector<1x96xf32>
    %37 = vector.broadcast %36 : vector<1x96xf32> to vector<12x96xf32>
    %38 = arith.addf %35, %37 : vector<12x96xf32>
    %cst_34 = arith.constant 0.000000e+00 : f32
    %39 = vector.broadcast %cst_34 : f32 to vector<12x96xf32>
    %40 = arith.maximumf %38, %39 : vector<12x96xf32>
    %c0_35 = arith.constant 0 : index
    %c0_36 = arith.constant 0 : index
    %c0_37 = arith.constant 0 : index
    %41 = vector.load %arg6[%c0_35, %c0_36, %c0_37] : memref<1x12x96xf32, #tpu.memory_space<vmem>>, vector<1x12x96xf32>
    %42 = vector.shape_cast %41 : vector<1x12x96xf32> to vector<12x96xf32>
    %43 = vector.shape_cast %40 : vector<12x96xf32> to vector<1x12x96xf32>
    tpu.vector_store %arg6[%c0_35, %c0_36, %c0_37], %43 {strides = array<i32>} : memref<1x12x96xf32, #tpu.memory_space<vmem>>, vector<1x12x96xf32>,
    return
  }
  func.func @transform_0(%arg0: i32) -> (i32, i32, i32) {
    %c0_i32 = arith.constant 0 : i32
    %c0_i32_0 = arith.constant 0 : i32
    %c0_i32_1 = arith.constant 0 : i32
    return %arg0, %c0_i32, %c0_i32_0 : i32, i32, i32
  }
  func.func @transform_1(%arg0: i32) -> (i32, i32, i32) {
    %c0_i32 = arith.constant 0 : i32
    %c0_i32_0 = arith.constant 0 : i32
    %c0_i32_1 = arith.constant 0 : i32
    %c0_i32_2 = arith.constant 0 : i32
    return %c0_i32, %c0_i32_0, %c0_i32_1 : i32, i32, i32
  }
  func.func @transform_2(%arg0: i32) -> (i32, i32) {
    %c0_i32 = arith.constant 0 : i32
    %c0_i32_0 = arith.constant 0 : i32
    %c0_i32_1 = arith.constant 0 : i32
    return %c0_i32, %c0_i32_0 : i32, i32
  }
  func.func @transform_3(%arg0: i32) -> (i32, i32, i32) {
    %c0_i32 = arith.constant 0 : i32
    %c0_i32_0 = arith.constant 0 : i32
    %c0_i32_1 = arith.constant 0 : i32
    %c0_i32_2 = arith.constant 0 : i32
    return %c0_i32, %c0_i32_0, %c0_i32_1 : i32, i32, i32
  }
  func.func @transform_4(%arg0: i32) -> (i32, i32) {
    %c0_i32 = arith.constant 0 : i32
    %c0_i32_0 = arith.constant 0 : i32
    %c0_i32_1 = arith.constant 0 : i32
    return %c0_i32, %c0_i32_0 : i32, i32
  }
  func.func @transform_5(%arg0: i32) -> (i32, i32, i32) {
    %c0_i32 = arith.constant 0 : i32
    %c0_i32_0 = arith.constant 0 : i32
    %c0_i32_1 = arith.constant 0 : i32
    return %arg0, %c0_i32, %c0_i32_0 : i32, i32, i32
  }
}

</mosaic_0001>

<bundles_post_ra>
// kernel: tpu_custom_call.1
= control target key start
LH: loop header
LB: loop body
LE: loop exit
PB: predicated region body
PF: predicated region fallthrough
CT: control target
= control target key end

     0   :  { %s1223_s18 = smov 0   ;;  %s1471_s0 = inlined_call_operand.vmem [shape: f32[2,16,64], index: 0, kind: input, shape index: {}]   ;;  %s1472_s1 = inlined_call_operand.vmem [shape: f32[3,64,112], index: 1, kind: input, shape index: {}]   ;;  %s1473_s2 = inlined_call_operand.vmem [shape: f32[1,112], index: 2, kind: input, shape index: {}]   ;;  %s1474_s3 = inlined_call_operand.vmem [shape: f32[3,112,96], index: 3, kind: input, shape index: {}]   ;;  %s1475_s4 = inlined_call_operand.vmem [shape: f32[1,96], index: 4, kind: input, shape index: {}]   ;;  %s1476_s5 = inlined_call_operand.vmem [shape: f32[2,12,96], index: 5, kind: output, shape index: {}]  }
   0x1 LB: > { %s878_s19 = sadd.s32 4294967295, %s1191_s18   ;;  %p882_p0 = scmp.ge.s32.totalorder %s1191_s18, 1  ;;  %s1191_s18 = sphi %s1223_s18, %s15_s18  }
   0x2   : > { %p187_p1 = scmp.lt.s32.totalorder %s1191_s18, 3 }
   0x4   : > { %p188_p2 = pnand %p882_p0, %p187_p1 }
   0x5   : > { %p215_p3 = scmp.lt.s32.totalorder (!%p188_p2), %s878_s19, 1 }
   0x6   : > { %191 = sbr.rel (%p188_p2) target bundleno = 481 (0x1e1), region = 40 }
   0xb   : > { %v894_v0 = vld [vmem:[%s1472_s1 + $0x78] sm:$0xff]  ;;  %v893_v2 = vld [vmem:[%s1472_s1 + $0x70] sm:$0xff]  ;;  %v892_v4 = vld [vmem:[%s1472_s1 + $0x68] sm:$0xff]  ;;  %s1478_s19 = smov (!%p215_p3, %s878_s19), 1  ;;  %vm246_vm0 = vcmask 523264   ;;  %vm549_vm1 = vcmask 916480  }
   0xc   : > { %v234_v1 = vld [vmem:[%s1472_s1 + $0x38] sm:$0xff]  ;;  %1027 = vmatprep.subr.mxu0 %v894_v0  ;;  %v233_v3 = vld [vmem:[%s1472_s1 + $0x30] sm:$0xff]  ;;  %v232_v5 = vld [vmem:[%s1472_s1 + $0x28] sm:$0xff]  ;;  %s947_s15 = sshll.u32 %s1478_s19, 4  ;;  %vm545_vm2 = vcmask 1046528   ;;  %vm723_vm3 = vcmask 1045504  }
   0xd   : > { %1046 = vmatprep.subr.mxu1 %v234_v1  ;;  %1028 = vmatpush3.msra.mxu0 %v894_v0  ;;  %v891_v6 = vld [vmem:[%s1472_s1 + $0x60] sm:$0xff]  ;;  %v890_v8 = vld [vmem:[%s1472_s1 + $0x58] sm:$0xff]  ;;  %v889_v10 = vld [vmem:[%s1472_s1 + $0x50] sm:$0xff]  ;;  %s1281_s28 = scalar_lea.vmem %s1471_s0, %s947_s15  ;;  %s224_s30 = scalar_lea.vmem %s1476_s5, %s947_s15  ;;  %vm821_vm4 = vcmask 781312   ;;  %vm819_vm5 = vcmask 785408  }
   0xe   : > { %1047 = vmatpush3.msra.mxu1 %v234_v1  ;;  %1029 = vmatprep.subr.mxu0 %v893_v2  ;;  %v231_v7 = vld [vmem:[%s1472_s1 + $0x20] sm:$0xff]  ;;  %v230_v9 = vld [vmem:[%s1472_s1 + $0x18] sm:$0xff]  ;;  %v229_v11 = vld [vmem:[%s1472_s1 + $0x10] sm:$0xff] }
   0xf   : > { %1048 = vmatprep.subr.mxu1 %v233_v3  ;;  %1030 = vmatpush3.msra.mxu0 %v893_v2  ;;  %v888_v12 = vld [vmem:[%s1472_s1 + $0x48] sm:$0xff]  ;;  %v887_v14 = vld [vmem:[%s1472_s1 + $0x40] sm:$0xff]  ;;  %v906_v20 = vld [vmem:[%s1472_s1 + $0xb8] sm:$0xff] }
  0x10   : > { %1049 = vmatpush3.msra.mxu1 %v233_v3  ;;  %1031 = vmatprep.subr.mxu0 %v892_v4  ;;  %v228_v13 = vld [vmem:[%s1472_s1 + $0x8] sm:$0xff]  ;;  %v227_v15 = vld [vmem:[%s1472_s1] sm:$0xff]  ;;  %v905_v22 = vld [vmem:[%s1472_s1 + $0xb0] sm:$0xff] }
  0x11   : > { %1050 = vmatprep.subr.mxu1 %v232_v5  ;;  %1032 = vmatpush3.msra.mxu0 %v892_v4  ;;  %v235_v16 = vld [vmem:[%s1281_s28 + $0x1] sm:$0xff]  ;;  %v236_v18 = vld [vmem:[%s1281_s28 + $0x9] sm:$0x3f]  ;;  %v902_v25 = vld [vmem:[%s1472_s1 + $0x98] sm:$0xff] }
  0x12   : > { %1051 = vmatpush3.msra.mxu1 %v232_v5  ;;  %1033 = vmatprep.subr.mxu0 %v891_v6  ;;  %v225_v17 = vld [vmem:[%s1281_s28] sm:$0xff]  ;;  %v226_v19 = vld [vmem:[%s1281_s28 + $0x8] sm:$0x3f]  ;;  %v901_v26 = vld [vmem:[%s1472_s1 + $0x90] sm:$0xff] }
  0x13   : > { %1052 = vmatprep.subr.mxu1 %v231_v7  ;;  %1034 = vmatpush3.msra.mxu0 %v891_v6  ;;  %v409_v21 = vld [vmem:[%s1281_s28 + $0x2] sm:$0xff]  ;;  %v410_v29 = vld [vmem:[%s1281_s28 + $0xa] sm:$0x3f]  ;;  %v923_v31 = vld [vmem:[%s1474_s3 + $0xd8] sm:$0xff] }
  0x14   : > { %1053 = vmatpush3.msra.mxu1 %v231_v7  ;;  %1035 = vmatprep.subr.mxu0 %v890_v8  ;;  %v904_v23 = vld [vmem:[%s1472_s1 + $0xa8] sm:$0xff]  ;;  %v903_v24 = vld [vmem:[%s1472_s1 + $0xa0] sm:$0xff]  ;;  %v922_v33 = vld [vmem:[%s1474_s3 + $0xd0] sm:$0xff] }
  0x15   : > { %1054 = vmatprep.subr.mxu1 %v230_v9  ;;  %1036 = vmatpush3.msra.mxu0 %v890_v8  ;;  %v900_v27 = vld [vmem:[%s1472_s1 + $0x88] sm:$0xff]  ;;  %v899_v28 = vld [vmem:[%s1472_s1 + $0x80] sm:$0xff]  ;;  %v525_v34 = vld [vmem:[%s1474_s3 + $0x58] sm:$0xff] }
  0x16   : > { %1055 = vmatpush3.msra.mxu1 %v230_v9  ;;  %1037 = vmatprep.subr.mxu0 %v889_v10  ;;  %v527_v30 = vld [vmem:[%s1474_s3 + $0x68] sm:$0xff]  ;;  %v526_v32 = vld [vmem:[%s1474_s3 + $0x60] sm:$0xff]  ;;  %v524_v36 = vld [vmem:[%s1474_s3 + $0x50] sm:$0xff] }
  0x17   : > { %1056 = vmatprep.subr.mxu1 %v229_v11  ;;  %1038 = vmatpush3.msra.mxu0 %v889_v10  ;;  %v921_v35 = vld [vmem:[%s1474_s3 + $0xc8] sm:$0xff]  ;;  %v920_v37 = vld [vmem:[%s1474_s3 + $0xc0] sm:$0xff]  ;;  %v919_v39 = vld [vmem:[%s1474_s3 + $0xb8] sm:$0xff] }
  0x18   : > { %1057 = vmatpush3.msra.mxu1 %v229_v11  ;;  %1039 = vmatprep.subr.mxu0 %v888_v12  ;;  %v523_v38 = vld [vmem:[%s1474_s3 + $0x48] sm:$0xff]  ;;  %v522_v40 = vld [vmem:[%s1474_s3 + $0x40] sm:$0xff]  ;;  %v918_v41 = vld [vmem:[%s1474_s3 + $0xb0] sm:$0xff] }
  0x19   : > { %1058 = vmatprep.subr.mxu1 %v228_v13  ;;  %1040 = vmatpush3.msra.mxu0 %v888_v12  ;;  %v521_v42 = vld [vmem:[%s1474_s3 + $0x38] sm:$0xff]  ;;  %v917_v43 = vld [vmem:[%s1474_s3 + $0xa8] sm:$0xff]  ;;  %v520_v44 = vld [vmem:[%s1474_s3 + $0x30] sm:$0xff] }
  0x1a   : > { %1059 = vmatpush3.msra.mxu1 %v228_v13  ;;  %1041 = vmatprep.subr.mxu0 %v887_v14  ;;  %v916_v45 = vld [vmem:[%s1474_s3 + $0xa0] sm:$0xff]  ;;  %v519_v46 = vld [vmem:[%s1474_s3 + $0x28] sm:$0xff]  ;;  %v915_v47 = vld [vmem:[%s1474_s3 + $0x98] sm:$0xff] }
  0x1b   : > { %1060 = vmatprep.subr.mxu1 %v227_v15  ;;  %1042 = vmatpush3.msra.mxu0 %v887_v14  ;;  %v518_v48 = vld [vmem:[%s1474_s3 + $0x20] sm:$0xff]  ;;  %v914_v49 = vld [vmem:[%s1474_s3 + $0x90] sm:$0xff]  ;;  %v517_v50 = vld [vmem:[%s1474_s3 + $0x18] sm:$0xff] }
  0x1c   : > { %1043 = vmatprep.mubr.msk.f32.mxu0 %vm246_vm0, %v235_v16  ;;  %1061 = vmatpush3.msra.mxu1 %v227_v15  ;;  %v913_v51 = vld [vmem:[%s1474_s3 + $0x88] sm:$0xff]  ;;  %v516_v52 = vld [vmem:[%s1474_s3 + $0x10] sm:$0xff]  ;;  %v912_v53 = vld [vmem:[%s1474_s3 + $0x80] sm:$0xff] }
  0x1d   : > { %1062 = vmatprep.mubr.msk.f32.mxu1 %vm246_vm0, %v225_v17  ;;  %1044 = vmatmul.mubr.msk.f32.vlgmr.msra.gmra.mxu0 %vm246_vm0, %v236_v18  ;;  %v515_v54 = vld [vmem:[%s1474_s3 + $0x8] sm:$0xff]  ;;  %v911_v55 = vld [vmem:[%s1474_s3 + $0x78] sm:$0xff]  ;;  %v514_v56 = vld [vmem:[%s1474_s3] sm:$0xff] }
  0x1e   : > { %1063 = vmatmul.mubr.msk.f32.vlgmr.msra.gmra.mxu1 %vm246_vm0, %v226_v19  ;;  %1065 = vmatprep.subr.mxu0 %v906_v20  ;;  %v910_v57 = vld [vmem:[%s1474_s3 + $0x70] sm:$0xff]  ;;  %v941_v58 = vld [vmem:[%s1474_s3 + $0x148] sm:$0xff]  ;;  %v909_v1 = vld [vmem:[%s1473_s2] ss:$0 sm:$0xff] }
  0x1f   : > { %1081 = vmatprep.mubr.msk.f32.mxu0 %vm246_vm0, %v409_v21  ;;  %1066 = vmatpush3.msra.mxu0 %v906_v20  ;;  %v940_v15 = vld [vmem:[%s1474_s3 + $0x140] sm:$0xff]  ;;  %v939_v17 = vld [vmem:[%s1474_s3 + $0x138] sm:$0xff]  ;;  %v938_v18 = vld [vmem:[%s1474_s3 + $0x130] sm:$0xff] }
  0x20   : > { %1067 = vmatprep.subr.mxu0 %v905_v22  ;;  %1084 = vmatprep.subr.mxu1 %v923_v31  ;;  %v937_v19 = vld [vmem:[%s1474_s3 + $0x128] sm:$0xff]  ;;  %v936_v20 = vld [vmem:[%s1474_s3 + $0x120] sm:$0xff]  ;;  %v935_v21 = vld [vmem:[%s1474_s3 + $0x118] sm:$0xff] }
  0x21   : > { %1068 = vmatpush3.msra.mxu0 %v905_v22  ;;  %1085 = vmatpush3.msra.mxu1 %v923_v31  ;;  %v934_v22 = vld [vmem:[%s1474_s3 + $0x110] sm:$0xff] }
  0x22   : > { %1069 = vmatprep.subr.mxu0 %v904_v23  ;;  %1086 = vmatprep.subr.mxu1 %v922_v33 }
  0x23   : > { %1070 = vmatpush3.msra.mxu0 %v904_v23  ;;  %1087 = vmatpush3.msra.mxu1 %v922_v33  ;;  %v933_v23 = vld [vmem:[%s1474_s3 + $0x108] sm:$0xff] }
  0x24   : > { %1071 = vmatprep.subr.mxu0 %v903_v24  ;;  %1088 = vmatprep.subr.mxu1 %v921_v35 }
  0x25   : > { %1072 = vmatpush3.msra.mxu0 %v903_v24  ;;  %1089 = vmatpush3.msra.mxu1 %v921_v35  ;;  %v932_v24 = vld [vmem:[%s1474_s3 + $0x100] sm:$0xff] }
  0x26   : > { %1073 = vmatprep.subr.mxu0 %v902_v25  ;;  %1090 = vmatprep.subr.mxu1 %v920_v37  ;;  %v944_v35 = vld [vmem:[%s1475_s4] ss:$0 sm:$0xff] }
  0x27   : > { %1074 = vmatpush3.msra.mxu0 %v902_v25  ;;  %1091 = vmatpush3.msra.mxu1 %v920_v37  ;;  %v931_v25 = vld [vmem:[%s1474_s3 + $0xf8] sm:$0xff] }
  0x28   : > { %1075 = vmatprep.subr.mxu0 %v901_v26  ;;  %1092 = vmatprep.subr.mxu1 %v919_v39 }
  0x29   : > { %1076 = vmatpush3.msra.mxu0 %v901_v26  ;;  %1093 = vmatpush3.msra.mxu1 %v919_v39  ;;  %v930_v26 = vld [vmem:[%s1474_s3 + $0xf0] sm:$0xff] }
  0x2a   : > { %1077 = vmatprep.subr.mxu0 %v900_v27  ;;  %1094 = vmatprep.subr.mxu1 %v918_v41 }
  0x2b   : > { %1078 = vmatpush3.msra.mxu0 %v900_v27  ;;  %1095 = vmatpush3.msra.mxu1 %v918_v41  ;;  %v929_v27 = vld [vmem:[%s1474_s3 + $0xe8] sm:$0xff] }
  0x2c   : > { %1079 = vmatprep.subr.mxu0 %v899_v28  ;;  %1096 = vmatprep.subr.mxu1 %v917_v43 }
  0x2d   : > { %1080 = vmatpush3.msra.mxu0 %v899_v28  ;;  %1097 = vmatpush3.msra.mxu1 %v917_v43  ;;  %v928_v28 = vld [vmem:[%s1474_s3 + $0xe0] sm:$0xff] }
  0x2e   : > { %1082 = vmatmul.mubr.msk.f32.vlgmr.msra.gmra.mxu0 %vm246_vm0, %v410_v29  ;;  %1115 = vmatprep.subr.mxu0 %v527_v30 }
  0x2f   : > { %1116 = vmatpush3.msra.mxu0 %v527_v30  ;;  %1098 = vmatprep.subr.mxu1 %v916_v45 }
  0x30   : > { %1117 = vmatprep.subr.mxu0 %v526_v32  ;;  %1099 = vmatpush3.msra.mxu1 %v916_v45 }
  0x31   : > { %1118 = vmatpush3.msra.mxu0 %v526_v32  ;;  %1100 = vmatprep.subr.mxu1 %v915_v47 }
  0x32   : > { %1119 = vmatprep.subr.mxu0 %v525_v34  ;;  %1101 = vmatpush3.msra.mxu1 %v915_v47 }
  0x33   : > { %1120 = vmatpush3.msra.mxu0 %v525_v34  ;;  %1102 = vmatprep.subr.mxu1 %v914_v49 }
  0x34   : > { %1121 = vmatprep.subr.mxu0 %v524_v36  ;;  %1103 = vmatpush3.msra.mxu1 %v914_v49 }
  0x35   : > { %1122 = vmatpush3.msra.mxu0 %v524_v36  ;;  %1104 = vmatprep.subr.mxu1 %v913_v51 }
  0x36   : > { %1123 = vmatprep.subr.mxu0 %v523_v38  ;;  %1105 = vmatpush3.msra.mxu1 %v913_v51 }
  0x37   : > { %1124 = vmatpush3.msra.mxu0 %v523_v38  ;;  %1106 = vmatprep.subr.mxu1 %v912_v53 }
  0x38   : > { %1125 = vmatprep.subr.mxu0 %v522_v40  ;;  %1107 = vmatpush3.msra.mxu1 %v912_v53 }
  0x39   : > { %1126 = vmatpush3.msra.mxu0 %v522_v40  ;;  %1108 = vmatprep.subr.mxu1 %v911_v55 }
  0x3a   : > { %1127 = vmatprep.subr.mxu0 %v521_v42  ;;  %1109 = vmatpush3.msra.mxu1 %v911_v55 }
  0x3b   : > { %1128 = vmatpush3.msra.mxu0 %v521_v42  ;;  %1110 = vmatprep.subr.mxu1 %v910_v57 }
  0x3c   : > { %1129 = vmatprep.subr.mxu0 %v520_v44  ;;  %1111 = vmatpush3.msra.mxu1 %v910_v57 }
  0x3d   : > { %1130 = vmatpush3.msra.mxu0 %v520_v44  ;;  %1146 = vmatprep.subr.mxu1 %v941_v58 }
  0x3e   : > { %1131 = vmatprep.subr.mxu0 %v519_v46 }
  0x3f   : > { %1132 = vmatpush3.msra.mxu0 %v519_v46 }
  0x40   : > { %1133 = vmatprep.subr.mxu0 %v518_v48 }
  0x41   : > { %1134 = vmatpush3.msra.mxu0 %v518_v48 }
  0x42   : > { %1135 = vmatprep.subr.mxu0 %v517_v50 }
  0x43   : > { %1136 = vmatpush3.msra.mxu0 %v517_v50 }
  0x44   : > { %1137 = vmatprep.subr.mxu0 %v516_v52 }
  0x45   : > { %1138 = vmatpush3.msra.mxu0 %v516_v52 }
  0x46   : > { %1139 = vmatprep.subr.mxu0 %v515_v54 }
  0x47   : > { %1140 = vmatpush3.msra.mxu0 %v515_v54 }
  0x48   : > { %1141 = vmatprep.subr.mxu0 %v514_v56 }
  0x49   : > { %1142 = vmatpush3.msra.mxu0 %v514_v56 }
  0xdd   : > { %v1045_v59 = vpop.f32.mrf.mxu0 }
  0xde   : > { %v1064_v60 = vpop.f32.mrf.mxu1 }
  0xdf   : > { %v319_v61 = vpop.f32.mrf.mxu0  ;;  %v406_v63 = vadd.f32 %v1064_v60, %v1045_v59 }
  0xe0   : > { %v400_v62 = vpop.f32.mrf.mxu1 }
  0xe1   : > { %v401_v2 = vadd.f32 %v400_v62, %v319_v61 }
  0xee   : > { %v1083_v0 = vpop.f32.mrf.mxu0 }
  0xef   : > { %v502_v3 = vadd.f32 %v1083_v0, %v406_v63 }
  0xf0   : > { %v492_v4 = vpop.f32.mrf.mxu0 }
  0xf1   : > { %v511_v5 = vadd.f32 %v909_v1, %v502_v3  ;;  %v501_v6 = vadd.f32 %v492_v4, %v401_v2 }
  0xf3   : > { %v513_v7 = vmax.f32 %v511_v5, 0.0  ;;  %v510_v8 = vadd.f32 %v909_v1, %v501_v6 }
  0xf5   : > { %v512_v9 = vmax.f32 %v510_v8, 0.0  ;;  %v547_v10 = vrot.slane %v513_v7, 1  ;;  %v725_v13 = vrot.slane %v513_v7, 2 }
  0xf7   : > { %v546_v11 = vrot.slane %v512_v9, 1  ;;  %v724_v12 = vrot.slane %v512_v9, 2  ;;  %1143 = vmatprep.mubr.msk.f32.mxu0 %vm549_vm1, %v512_v9 }
  0xf8   : > { %1144 = vmatmul.mubr.msk.f32.vlgmr.msra.gmra.mxu0 %vm549_vm1, %v513_v7 }
  0xf9   : > { %v548_v14 = vsel %vm545_vm2, %v546_v11, %v547_v10  ;;  %v726_v16 = vsel %vm723_vm3, %v724_v12, %v725_v13 }
  0xfa   : > { %1112 = vmatprep.mubr.msk.f32.mxu1 %vm549_vm1, %v548_v14 }
  0xfb   : > { %1113 = vmatmul.mubr.msk.f32.vlgmr.msra.gmra.mxu1 %vm549_vm1, %v547_v10 }
  0xfc   : > { %1147 = vmatpush3.msra.mxu1 %v941_v58  ;;  %1174 = vmatprep.mubr.msk.f32.mxu1 %vm549_vm1, %v726_v16 }
  0xfd   : > { %1148 = vmatprep.subr.mxu1 %v940_v15 }
  0xfe   : > { %1149 = vmatpush3.msra.mxu1 %v940_v15 }
  0xff   : > { %1150 = vmatprep.subr.mxu1 %v939_v17 }
 0x100   : > { %1151 = vmatpush3.msra.mxu1 %v939_v17 }
 0x101   : > { %1152 = vmatprep.subr.mxu1 %v938_v18 }
 0x102   : > { %1153 = vmatpush3.msra.mxu1 %v938_v18 }
 0x103   : > { %1154 = vmatprep.subr.mxu1 %v937_v19 }
 0x104   : > { %1155 = vmatpush3.msra.mxu1 %v937_v19 }
 0x105   : > { %1156 = vmatprep.subr.mxu1 %v936_v20 }
 0x106   : > { %1157 = vmatpush3.msra.mxu1 %v936_v20 }
 0x107   : > { %1158 = vmatprep.subr.mxu1 %v935_v21 }
 0x108   : > { %1159 = vmatpush3.msra.mxu1 %v935_v21 }
 0x109   : > { %1160 = vmatprep.subr.mxu1 %v934_v22 }
 0x10a   : > { %1161 = vmatpush3.msra.mxu1 %v934_v22 }
 0x10b   : > { %1162 = vmatprep.subr.mxu1 %v933_v23 }
 0x10c   : > { %1163 = vmatpush3.msra.mxu1 %v933_v23 }
 0x10d   : > { %1164 = vmatprep.subr.mxu1 %v932_v24 }
 0x10e   : > { %1165 = vmatpush3.msra.mxu1 %v932_v24 }
 0x10f   : > { %1166 = vmatprep.subr.mxu1 %v931_v25 }
 0x110   : > { %1167 = vmatpush3.msra.mxu1 %v931_v25 }
 0x111   : > { %1168 = vmatprep.subr.mxu1 %v930_v26 }
 0x112   : > { %1169 = vmatpush3.msra.mxu1 %v930_v26 }
 0x113   : > { %1170 = vmatprep.subr.mxu1 %v929_v27 }
 0x114   : > { %1171 = vmatpush3.msra.mxu1 %v929_v27 }
 0x115   : > { %1172 = vmatprep.subr.mxu1 %v928_v28 }
 0x116   : > { %1173 = vmatpush3.msra.mxu1 %v928_v28 }
 0x117   : > { %1175 = vmatmul.mubr.msk.f32.vlgmr.msra.gmra.mxu1 %vm549_vm1, %v725_v13 }
 0x1b8   : > { %v1145_v30 = vpop.f32.mrf.mxu0 }
 0x1ba   : > { %v699_v33 = vpop.f32.mrf.mxu0 }
 0x1bb   : > { %v1114_v29 = vpop.f32.mrf.mxu1 }
 0x1bc   : > { %v705_v32 = vadd.f32 %v1145_v30, %v1114_v29 }
 0x1bd   : > { %v620_v31 = vpop.f32.mrf.mxu1 }
 0x1be   : > { %v700_v36 = vadd.f32 %v699_v33, %v620_v31 }
 0x1d7   : > { %v1176_v34 = vpop.f32.mrf.mxu1 }
 0x1d8   : > { %v807_v37 = vadd.f32 %v1176_v34, %v705_v32 }
 0x1d9   : > { %v797_v38 = vpop.f32.mrf.mxu1 }
 0x1da   : > { %v816_v39 = vadd.f32 %v944_v35, %v807_v37  ;;  %v806_v40 = vadd.f32 %v797_v38, %v700_v36 }
 0x1dc   : > { %v818_v41 = vmax.f32 %v816_v39, 0.0  ;;  %v815_v42 = vadd.f32 %v944_v35, %v806_v40 }
 0x1de   : > { %822 = vst.msk [vmem:[%s224_s30 + $0x8] sm:$0xf] %vm821_vm4, %v818_v41  ;;  %v817_v43 = vmax.f32 %v815_v42, 0.0 }
 0x1e0   : > { %820 = vst.msk [vmem:[%s224_s30] sm:$0xff] %vm819_vm5, %v817_v43 }
 0x1e1 PF: > { %s15_s18 = sadd.s32 1, %s1191_s18  }
 0x1e2   : > { %p12_p4 = scmp.ge.s32.totalorder %s15_s18, 4  }
 0x1e4   :  { %14 = sbr.rel (!%p12_p4) target bundleno = 1 (0x1), region = 74 }

</bundles_post_ra>
